<compile_context>
chip_gen: v5e
topology: v5e:2x2
jax: 0.10.0
libtpu: 0.0.40
codegen_flags: <defaults>
</compile_context>

<pallas_src>
import functools

import jax
import jax.numpy as jnp
from jax import lax
from jax.experimental import pallas as pl
from jax.experimental.pallas import tpu as pltpu

EPS = 1e-7
_MIB = 1024 * 1024
_BLOCK_TARGET_BYTES = 4 * _MIB  # ~4 MiB per (largest) input block: HBM-roofline sweet spot


def _exposure_history_loss_kernel(pred_ref, tgt_ref, mask_ref, out_ref,
                                  num_sc, den_sc, *,
                                  n_rows, n_cols, need_row_mask, need_col_mask):
    """Blocks: pred/tgt/mask (TB, TM) in native dtype; out (TB, 1) f32.

    Grid = (batch tiles [parallel], history tiles [arbitrary, last]).
    num_sc/den_sc are (TB, 1) f32 accumulators resident across the history axis.
    """
    i = pl.program_id(0)
    j = pl.program_id(1)

    @pl.when(j == 0)
    def _():
        num_sc[...] = jnp.zeros_like(num_sc)
        den_sc[...] = jnp.zeros_like(den_sc)

    # Native-dtype DMA, f32 up-cast in-vreg (cheap VPU op; halves HBM bytes for bf16).
    x = pred_ref[...].astype(jnp.float32)
    y = tgt_ref[...].astype(jnp.float32)
    m = mask_ref[...].astype(jnp.float32)
    tb, tm = x.shape

    # Numerically-stable BCE-with-logits (identical to torch.nn.BCEWithLogitsLoss):
    #   l = max(x, 0) - x*y + log(1 + exp(-|x|))
    bce = jnp.maximum(x, 0.0) - x * y + jnp.log1p(jnp.exp(-jnp.abs(x)))

    # Mask out-of-bounds rows/cols of partial tail blocks (Pallas does not zero-fill
    # OOB block reads).  jnp.where is NaN/Inf-safe for the unselected garbage lanes.
    valid = None
    if need_row_mask:
        valid = (i * tb + lax.broadcasted_iota(jnp.int32, (tb, tm), 0)) < n_rows
    if need_col_mask:
        cv = (j * tm + lax.broadcasted_iota(jnp.int32, (tb, tm), 1)) < n_cols
        valid = cv if valid is None else (valid & cv)
    if valid is not None:
        bce = jnp.where(valid, bce, 0.0)
        m = jnp.where(valid, m, 0.0)

    num_sc[...] += jnp.sum(bce * m, axis=-1, keepdims=True)
    den_sc[...] += jnp.sum(m, axis=-1, keepdims=True)

    @pl.when(j == pl.num_programs(1) - 1)
    def _():
        out_ref[...] = num_sc[...] / (den_sc[...] + EPS)


def _round_up(x, m):
    return ((x + m - 1) // m) * m


def _vmem_budget():
    """(vmem_limit_bytes, double-buffered working-set budget), generation-aware."""
    try:
        cap = int(pltpu.get_tpu_info().vmem_capacity_bytes)
    except Exception:
        cap = 64 * _MIB                      # conservative fallback (v7x-sized)
    if cap >= 96 * _MIB:                     # v5e / v6e: 128 MiB physical VMEM
        return 64 * _MIB, 48 * _MIB
    return 32 * _MIB, 24 * _MIB              # v7x: 64 MiB physical VMEM


def _choose_tiles(n_rows, n_cols, itemsizes, ws_budget):
    """Pick (TB, TM): batch tile and history tile.

    Targets ~_BLOCK_TARGET_BYTES for the largest input block while keeping the
    double-buffered working set (3 inputs x 2 buffers) under ws_budget.
    """
    max_it = max(itemsizes)
    sum_it = sum(itemsizes)

    def tb_for(tm):
        per_block = _BLOCK_TARGET_BYTES // (tm * max_it)
        per_vmem = ws_budget // (2 * tm * sum_it)
        return min(per_block, per_vmem)

    tm = n_cols                              # common case: full-extent history axis
    tb = tb_for(tm)
    if tb < 8:
        # Extremely long histories: tile M (lane dim must be a multiple of 128 when
        # it is not the full extent) so a >=32-row block stays on target.
        tm = max(128, (_BLOCK_TARGET_BYTES // (32 * max_it)) // 128 * 128)
        tm = min(tm, _round_up(n_cols, 128))
        tb = tb_for(tm)

    tb = min(tb, n_rows)                     # never larger than the array itself
    if tb >= 32:
        tb = (tb // 32) * 32                 # sublane packing for f32/bf16/int8 inputs
    else:
        tb = max(8, (tb // 8) * 8)
    return tb, tm


def exposure_history_loss(pred, target, mask, sample_weight=None):
    """JAX/Pallas equivalent of ExposureHistoryLoss.forward (BCEWithLogits branch)."""
    assert pred.ndim == 3, "Input should be a BMC tensor."
    assert mask.ndim == 2, "Mask should be a BM tensor."
    assert target.shape == pred.shape, "BCEWithLogitsLoss requires target.shape == input.shape."
    B, M, _C = pred.shape

    # Only channel 0 of the elementwise loss is ever used -> slice here, native dtype.
    pred0 = pred[..., 0]
    tgt0 = target[..., 0]

    # Keep the mask narrow; f32 up-cast happens in-vreg inside the kernel.
    if mask.dtype == jnp.bool_:
        mask = mask.astype(jnp.int8)

    # Tiny-batch corner case only: pad up to one 8-row sublane tile with zero rows
    # (zero logits/targets/mask contribute exactly 0).  Large batches are NOT padded.
    if B < 8:
        pad = 8 - B
        pred0 = jnp.pad(pred0, ((0, pad), (0, 0)))
        tgt0 = jnp.pad(tgt0, ((0, pad), (0, 0)))
        mask = jnp.pad(mask, ((0, pad), (0, 0)))
    n_rows = pred0.shape[0]

    itemsizes = [jnp.dtype(a.dtype).itemsize for a in (pred0, tgt0, mask)]
    vmem_limit, ws_budget = _vmem_budget()
    tb, tm = _choose_tiles(n_rows, M, itemsizes, ws_budget)

    grid_b = pl.cdiv(n_rows, tb)
    grid_m = pl.cdiv(M, tm)

    kernel = functools.partial(
        _exposure_history_loss_kernel,
        n_rows=n_rows, n_cols=M,
        need_row_mask=(n_rows % tb != 0),
        need_col_mask=(M % tm != 0),
    )

    # Output stays (TB, 1): a masked lane-0 store once per batch tile is <1% of the
    # input HBM traffic here, so the lane-dense-output lever is not worth the layout.
    per_sample = pl.pallas_call(
        kernel,
        out_shape=jax.ShapeDtypeStruct((grid_b * tb, 1), jnp.float32),
        grid=(grid_b, grid_m),
        in_specs=[
            pl.BlockSpec((tb, tm), lambda i, j: (i, j)),
            pl.BlockSpec((tb, tm), lambda i, j: (i, j)),
            pl.BlockSpec((tb, tm), lambda i, j: (i, j)),
        ],
        out_specs=pl.BlockSpec((tb, 1), lambda i, j: (i, 0)),
        scratch_shapes=[pltpu.VMEM((tb, 1), jnp.float32),
                        pltpu.VMEM((tb, 1), jnp.float32)],
        compiler_params=pltpu.CompilerParams(
            dimension_semantics=("parallel", "arbitrary"),
            vmem_limit_bytes=vmem_limit,
        ),
    )(pred0, tgt0, mask)

    per_sample = per_sample[:B, 0]
    if sample_weight is None:
        return jnp.mean(per_sample)
    w = jnp.asarray(sample_weight, jnp.float32).reshape(B)
    return jnp.mean(per_sample * w)


def _reference(pred, target, mask, sample_weight=None):
    x = pred[:, :, 0].astype(jnp.float32)
    y = target[:, :, 0].astype(jnp.float32)
    m = mask.astype(jnp.float32)
    bce = jnp.maximum(x, 0.0) - x * y + jnp.log1p(jnp.exp(-jnp.abs(x)))
    per_sample = (bce * m).sum(-1) / (m.sum(-1) + EPS)
    if sample_weight is None:
        return per_sample.mean()
    return (per_sample * jnp.asarray(sample_weight, jnp.float32)).mean()


if __name__ == "__main__":
    B, M, C = 2, 8, 4
    key = jax.random.PRNGKey(0)
    k_pred, k_tgt, k_mask, k_w = jax.random.split(key, 4)

    # model_output['exposure_history'] : (B, M, C) logits
    pred = jax.random.normal(k_pred, (B, M, C), dtype=jnp.float32)
    # model_input.exposure_history : (B, M, C) binary targets
    target = jax.random.bernoulli(k_tgt, 0.5, (B, M, C)).astype(jnp.float32)
    # model_input['valid_history_mask'] : (B, M) mask (guarantee some valid entries)
    mask = jax.random.bernoulli(k_mask, 0.7, (B, M)).astype(jnp.float32)
    mask = mask.at[:, 0].set(1.0)
    # optional sample_weight : (B,)
    sample_weight = jax.random.uniform(k_w, (B,), dtype=jnp.float32) + 0.5

    # 1) No sample weights
    loss = exposure_history_loss(pred, target, mask, None)
    jax.block_until_ready(loss)
    ref = _reference(pred, target, mask, None)
    assert jnp.allclose(loss, ref, rtol=1e-4, atol=1e-6), (loss, ref)

    # 2) With sample weights
    loss_w = exposure_history_loss(pred, target, mask, sample_weight)
    jax.block_until_ready(loss_w)
    ref_w = _reference(pred, target, mask, sample_weight)
    assert jnp.allclose(loss_w, ref_w, rtol=1e-4, atol=1e-6), (loss_w, ref_w)

    # 3) Boolean mask (narrow int8 DMA path)
    mask_b = mask > 0.5
    loss_b = exposure_history_loss(pred, target, mask_b, None)
    jax.block_until_ready(loss_b)
    ref_b = _reference(pred, target, mask_b.astype(jnp.float32), None)
    assert jnp.allclose(loss_b, ref_b, rtol=1e-4, atol=1e-6), (loss_b, ref_b)

    # 4) bf16 inputs (native-dtype DMA, f32 in-vreg compute)
    pred_bf = pred.astype(jnp.bfloat16)
    tgt_bf = target.astype(jnp.bfloat16)
    loss_bf = exposure_history_loss(pred_bf, tgt_bf, mask, None)
    jax.block_until_ready(loss_bf)
    ref_bf = _reference(pred_bf, tgt_bf, mask, None)
    assert jnp.allclose(loss_bf, ref_bf, rtol=1e-4, atol=1e-6), (loss_bf, ref_bf)

    # 5) Larger batch with a partial tail tile (exercises no-pad + in-kernel row masking)
    B2, M2 = 37, 256
    kp2, kt2, km2 = jax.random.split(jax.random.PRNGKey(1), 3)
    pred2 = jax.random.normal(kp2, (B2, M2, C), dtype=jnp.float32)
    target2 = jax.random.bernoulli(kt2, 0.5, (B2, M2, C)).astype(jnp.float32)
    mask2 = jax.random.bernoulli(km2, 0.6, (B2, M2)).astype(jnp.float32)
    mask2 = mask2.at[:, 0].set(1.0)
    loss2 = exposure_history_loss(pred2, target2, mask2, None)
    jax.block_until_ready(loss2)
    ref2 = _reference(pred2, target2, mask2, None)
    assert jnp.allclose(loss2, ref2, rtol=1e-4, atol=1e-5), (loss2, ref2)

    print("KERNEL_OK")
</pallas_src>

<mosaic_0001>
module attributes {stable_mosaic.version = 11 : i64} {
  func.func @_exposure_history_loss_kernel(%arg0: i32, %arg1: i32, %arg2: memref<8x8xf32, #tpu.memory_space<vmem>>, %arg3: memref<8x8xf32, #tpu.memory_space<vmem>>, %arg4: memref<8x8xf32, #tpu.memory_space<vmem>>, %arg5: memref<8x1xf32, #tpu.memory_space<vmem>>, %arg6: memref<8x1xf32, #tpu.memory_space<vmem>>, %arg7: memref<8x1xf32, #tpu.memory_space<vmem>>) attributes {dimension_semantics = [#tpu.dimension_semantics<parallel>, #tpu.dimension_semantics<arbitrary>], iteration_bounds = array<i64: 1, 1>, scalar_prefetch = 0 : i64, scratch_operands = 2 : i64, tpu.core_type = #tpu.core_type<tc>, window_params = [{transform_indices = @transform_0, window_bounds = array<i64: 8, 8>}, {transform_indices = @transform_1, window_bounds = array<i64: 8, 8>}, {transform_indices = @transform_2, window_bounds = array<i64: 8, 8>}, {transform_indices = @transform_3, window_bounds = array<i64: 8, 1>}]} {
    %c0_i32 = arith.constant 0 : i32
    %0 = arith.cmpi eq, %arg1, %c0_i32 : i32
    %1 = arith.extui %0 : i1 to i32
    %c0_i32_0 = arith.constant 0 : i32
    %2 = arith.cmpi ne, %1, %c0_i32_0 : i32
    scf.if %2 {
      %cst_19 = arith.constant 0.000000e+00 : f32
      %30 = vector.broadcast %cst_19 : f32 to vector<8x1xf32>
      %c0_20 = arith.constant 0 : index
      %c0_21 = arith.constant 0 : index
      %31 = vector.load %arg6[%c0_20, %c0_21] : memref<8x1xf32, #tpu.memory_space<vmem>>, vector<8x1xf32>
      tpu.vector_store %arg6[%c0_20, %c0_21], %30 {strides = array<i32>} : memref<8x1xf32, #tpu.memory_space<vmem>>, vector<8x1xf32>,
      %cst_22 = arith.constant 0.000000e+00 : f32
      %32 = vector.broadcast %cst_22 : f32 to vector<8x1xf32>
      %c0_23 = arith.constant 0 : index
      %c0_24 = arith.constant 0 : index
      %33 = vector.load %arg7[%c0_23, %c0_24] : memref<8x1xf32, #tpu.memory_space<vmem>>, vector<8x1xf32>
      tpu.vector_store %arg7[%c0_23, %c0_24], %32 {strides = array<i32>} : memref<8x1xf32, #tpu.memory_space<vmem>>, vector<8x1xf32>,
    } else {
    }
    %c0 = arith.constant 0 : index
    %c0_1 = arith.constant 0 : index
    %3 = vector.load %arg2[%c0, %c0_1] : memref<8x8xf32, #tpu.memory_space<vmem>>, vector<8x8xf32>
    %c0_2 = arith.constant 0 : index
    %c0_3 = arith.constant 0 : index
    %4 = vector.load %arg3[%c0_2, %c0_3] : memref<8x8xf32, #tpu.memory_space<vmem>>, vector<8x8xf32>
    %c0_4 = arith.constant 0 : index
    %c0_5 = arith.constant 0 : index
    %5 = vector.load %arg4[%c0_4, %c0_5] : memref<8x8xf32, #tpu.memory_space<vmem>>, vector<8x8xf32>
    %cst = arith.constant 0.000000e+00 : f32
    %6 = vector.broadcast %cst : f32 to vector<8x8xf32>
    %7 = arith.maximumf %3, %6 : vector<8x8xf32>
    %8 = arith.mulf %3, %4 : vector<8x8xf32>
    %9 = arith.subf %7, %8 : vector<8x8xf32>
    %10 = math.absf %3 : vector<8x8xf32>
    %cst_6 = arith.constant 0.000000e+00 : f32
    %11 = vector.broadcast %cst_6 : f32 to vector<8x8xf32>
    %12 = arith.subf %11, %10 : vector<8x8xf32>
    %13 = math.exp %12 : vector<8x8xf32>
    %14 = math.log1p %13 : vector<8x8xf32>
    %15 = arith.addf %9, %14 : vector<8x8xf32>
    %c0_7 = arith.constant 0 : index
    %c0_8 = arith.constant 0 : index
    %16 = vector.load %arg6[%c0_7, %c0_8] : memref<8x1xf32, #tpu.memory_space<vmem>>, vector<8x1xf32>
    %17 = arith.mulf %15, %5 : vector<8x8xf32>
    %cst_9 = arith.constant dense<0.000000e+00> : vector<8xf32>
    %18 = vector.multi_reduction <add>, %17, %cst_9 [1] : vector<8x8xf32> to vector<8xf32>
    %19 = vector.shape_cast %18 : vector<8xf32> to vector<8x1xf32>
    %20 = arith.addf %16, %19 : vector<8x1xf32>
    %c0_10 = arith.constant 0 : index
    %c0_11 = arith.constant 0 : index
    %21 = vector.load %arg6[%c0_10, %c0_11] : memref<8x1xf32, #tpu.memory_space<vmem>>, vector<8x1xf32>
    tpu.vector_store %arg6[%c0_10, %c0_11], %20 {strides = array<i32>} : memref<8x1xf32, #tpu.memory_space<vmem>>, vector<8x1xf32>,
    %c0_12 = arith.constant 0 : index
    %c0_13 = arith.constant 0 : index
    %22 = vector.load %arg7[%c0_12, %c0_13] : memref<8x1xf32, #tpu.memory_space<vmem>>, vector<8x1xf32>
    %cst_14 = arith.constant dense<0.000000e+00> : vector<8xf32>
    %23 = vector.multi_reduction <add>, %5, %cst_14 [1] : vector<8x8xf32> to vector<8xf32>
    %24 = vector.shape_cast %23 : vector<8xf32> to vector<8x1xf32>
    %25 = arith.addf %22, %24 : vector<8x1xf32>
    %c0_15 = arith.constant 0 : index
    %c0_16 = arith.constant 0 : index
    %26 = vector.load %arg7[%c0_15, %c0_16] : memref<8x1xf32, #tpu.memory_space<vmem>>, vector<8x1xf32>
    tpu.vector_store %arg7[%c0_15, %c0_16], %25 {strides = array<i32>} : memref<8x1xf32, #tpu.memory_space<vmem>>, vector<8x1xf32>,
    %c0_i32_17 = arith.constant 0 : i32
    %27 = arith.cmpi eq, %arg1, %c0_i32_17 : i32
    %28 = arith.extui %27 : i1 to i32
    %c0_i32_18 = arith.constant 0 : i32
    %29 = arith.cmpi ne, %28, %c0_i32_18 : i32
    scf.if %29 {
      %c0_19 = arith.constant 0 : index
      %c0_20 = arith.constant 0 : index
      %30 = vector.load %arg6[%c0_19, %c0_20] : memref<8x1xf32, #tpu.memory_space<vmem>>, vector<8x1xf32>
      %c0_21 = arith.constant 0 : index
      %c0_22 = arith.constant 0 : index
      %31 = vector.load %arg7[%c0_21, %c0_22] : memref<8x1xf32, #tpu.memory_space<vmem>>, vector<8x1xf32>
      %cst_23 = arith.constant 1.000000e-07 : f32
      %32 = vector.broadcast %cst_23 : f32 to vector<8x1xf32>
      %33 = arith.addf %31, %32 : vector<8x1xf32>
      %34 = arith.divf %30, %33 : vector<8x1xf32>
      %c0_24 = arith.constant 0 : index
      %c0_25 = arith.constant 0 : index
      %35 = vector.load %arg5[%c0_24, %c0_25] : memref<8x1xf32, #tpu.memory_space<vmem>>, vector<8x1xf32>
      tpu.vector_store %arg5[%c0_24, %c0_25], %34 {strides = array<i32>} : memref<8x1xf32, #tpu.memory_space<vmem>>, vector<8x1xf32>,
    } else {
    }
    return
  }
  func.func @transform_0(%arg0: i32, %arg1: i32) -> (i32, i32) {
    %c0_i32 = arith.constant 0 : i32
    return %arg0, %arg1 : i32, i32
  }
  func.func @transform_1(%arg0: i32, %arg1: i32) -> (i32, i32) {
    %c0_i32 = arith.constant 0 : i32
    return %arg0, %arg1 : i32, i32
  }
  func.func @transform_2(%arg0: i32, %arg1: i32) -> (i32, i32) {
    %c0_i32 = arith.constant 0 : i32
    return %arg0, %arg1 : i32, i32
  }
  func.func @transform_3(%arg0: i32, %arg1: i32) -> (i32, i32) {
    %c0_i32 = arith.constant 0 : i32
    %c0_i32_0 = arith.constant 0 : i32
    return %arg0, %c0_i32 : i32, i32
  }
}

</mosaic_0001>

<bundles_post_ra>
// kernel: tpu_custom_call.1
= control target key start
LH: loop header
LB: loop body
LE: loop exit
PB: predicated region body
PF: predicated region fallthrough
CT: control target
= control target key end

     0   :  { %8 = vsyncpa [#allocation5], 0  ;;  %s254_s0 = inlined_call_operand.hbm [shape: f32[8,8], index: 0, kind: input, shape index: {}]   ;;  %s255_s1 = inlined_call_operand.hbm [shape: f32[8,8], index: 1, kind: input, shape index: {}]   ;;  %s256_s2 = inlined_call_operand.hbm [shape: f32[8,8], index: 2, kind: input, shape index: {}]   ;;  %s257_s3 = inlined_call_operand.vmem [shape: f32[8,1], index: 3, kind: output, shape index: {}]  }
   0x1   :  { %9 = vsyncpa [#allocation7], 0  ;;  %s26_s14 = sshll.u32 %s255_s1, 4  ;;  %s211_s15 = smov [#allocation6]   ;;  %s27_s14 = int_to_ptr.hbm [resolvable:$true] %s26_s14 }
   0x2   :  { %s28_s16 = sshll.u32 %s211_s15, 4  ;;  %s15_s19 = sshll.u32 %s254_s0, 4  ;;  %s29_s16 = int_to_ptr.vmem [resolvable:$true] %s28_s16  ;;  %s16_s19 = int_to_ptr.hbm [resolvable:$true] %s15_s19 }
   0x3   :  { %31 = dma.hbm_to_vmem [thread:$0]  %s27_s14, 128, %s29_s16, [#allocation7]  }
   0x4   :  { %s212_s20 = smov [#allocation4]   ;;  %s37_s24 = sshll.u32 %s256_s2, 4  ;;  %s38_s24 = int_to_ptr.hbm [resolvable:$true] %s37_s24 }
   0x5   :  { %s17_s21 = sshll.u32 %s212_s20, 4  ;;  %s213_s1 = smov [#allocation8]   ;;  %s18_s21 = int_to_ptr.vmem [resolvable:$true] %s17_s21 }
   0x6   :  { %20 = dma.hbm_to_vmem [thread:$0]  %s16_s19, 128, %s18_s21, [#allocation5]  }
   0x7   :  { %s39_s25 = sshll.u32 %s213_s1, 4  ;;  %s40_s25 = int_to_ptr.vmem [resolvable:$true] %s39_s25 }
   0x8   :  { %42 = dma.hbm_to_vmem [thread:$0]  %s38_s24, 128, %s40_s25, [#allocation7]  }
   0x9   :  { %207 = dma.done.wait [#allocation5], 128  }
   0xa   :  { %208 = vsyncadd [#allocation5], 4294967168 }
   0xb   :  { %209 = dma.done.wait [#allocation7], 256  }
   0xc   :  { %210 = vsyncadd [#allocation7], 4294967040  ;;  %vm84_vm0 = vcmask 64512   ;;  %vm59_vm1 = vcmask 7168   ;;  %v64_v0 = vld [vmem:[#allocation8] sm:$0xff]  ;;  %v62_v1 = vld [vmem:[#allocation4] sm:$0xff] }
   0xd   :  { %v214_v2 = vmov 0.0   ;;  %v92_v3 = vsel %vm84_vm0, %v64_v0, 0.0  ;;  %v68_v4 = vand.u32 2147483647, %v62_v1  ;;  %v63_v10 = vld [vmem:[#allocation6] sm:$0xff]  ;;  %v65_v12 = vmax.f32 %v62_v1, 0.0 }
   0xe   :  { %61 = vst.msk [vmem:[#allocation3] sm:$0xff] %vm59_vm1, %v214_v2  ;;  %93 = vadd.xlane.f32.xlu0 %v92_v3  ;;  %v66_v13 = vmul.f32 %v63_v10, %v62_v1 }
   0xf   :  { %60 = vst.msk [vmem:[#allocation2] sm:$0xff] %vm59_vm1, %v214_v2  ;;  %v69_v5 = vsub.f32 0.0, %v68_v4 }
  0x10   :  { %v67_v17 = vsub.f32 %v65_v12, %v66_v13 }
  0x11   :  { %v70_v6 = vmul.f32 1.442695, %v69_v5 }
  0x13   :  { %129 = vpow2.f32 %v70_v6 }
  0x15   :  { %v91_v23 = vld [vmem:[#allocation3] sm:$0xff] }
  0x16   :  { %v82_v31 = vld [vmem:[#allocation2] sm:$0xff] }
  0x19   :  { %v130_v7 = vpop.eup %129 }
  0x1a   :  { %v72_v8 = vadd.f32 1.0, %v130_v7  ;;  %v75_v9 = vmul.f32 -0.5, %v130_v7  ;;  %v78_v14 = vand.u32 2147483647, %v130_v7 }
  0x1c   :  { %131 = vlog2.f32 %v72_v8  ;;  %v76_v11 = vadd.f32 1.0, %v75_v9  ;;  %vm79_vm2 = vcmp.lt.f32.partialorder %v78_v14, 0.0004427343 }
  0x1e   :  { %v77_v15 = vmul.f32 %v130_v7, %v76_v11 }
  0x22   :  { %v132_v16 = vpop.eup %131 }
  0x23   :  { %v74_v18 = vmul.f32 0.6931472, %v132_v16 }
  0x25   :  { %v80_v19 = vsel %vm79_vm2, %v77_v15, %v74_v18 }
  0x26   :  { %v81_v20 = vadd.f32 %v80_v19, %v67_v17 }
  0x28   :  { %v83_v21 = vmul.f32 %v81_v20, %v64_v0 }
  0x2a   :  { %v85_v22 = vsel %vm84_vm0, %v83_v21, 0.0 }
  0x2b   :  { %86 = vadd.xlane.f32.xlu0 %v85_v22 }
  0x81   :  { %v94_v24 = vpop.xlane.xlu0 %93 }
  0x82   :  { %v95_v25 = vadd.f32 %v94_v24, %v91_v23 }
  0x84   :  { %96 = vst.msk [vmem:[#allocation3] sm:$0xff] %vm59_vm1, %v95_v25 }
  0x8b   :  { %v101_v26 = vld [vmem:[#allocation3] sm:$0xff] }
  0x8c   :  { %v102_v27 = vadd.f32 1e-07, %v101_v26 }
  0x8e   :  { %133 = vrcp.f32 %v102_v27  ;;  %vm108_vm3 = vweird.f32 %v102_v27  ;;  %v114_v36 = vand.u32 2147483648, %v102_v27  ;;  %v112_v37 = vand.u32 2147483647, %v102_v27 }
  0x90   :  { %v115_v39 = vor.u32 1.1754944e-38, %v114_v36  ;;  %vm113_vm6 = vcmp.eq.f32.partialorder %v112_v37, 8.507059e+37 }
  0x94   :  { %v134_v28 = vpop.eup %133 }
  0x95   :  { %v104_v29 = vmul.f32 %v134_v28, %v102_v27  ;;  %vm109_vm4 = vweird.f32 %v134_v28 }
  0x96   :  { %vm110_vm5 = vmor %vm108_vm3, %vm109_vm4 }
  0x97   :  { %v105_v30 = vsub.f32 1.0, %v104_v29 }
  0x99   :  { %v106_v32 = vmul.f32 %v134_v28, %v105_v30 }
  0x9b   :  { %v107_v35 = vadd.f32 %v134_v28, %v106_v32 }
  0x9d   :  { %v111_v38 = vsel %vm110_vm5, %v134_v28, %v107_v35 }
  0x9e   :  { %v87_v33 = vpop.xlane.xlu0 %86  ;;  %v116_v41 = vsel %vm113_vm6, %v115_v39, %v111_v38 }
  0x9f   :  { %v88_v34 = vadd.f32 %v87_v33, %v82_v31 }
  0xa1   :  { %90 = vst.msk [vmem:[#allocation2] sm:$0xff] %vm59_vm1, %v88_v34 }
  0xa8   :  { %v100_v40 = vld [vmem:[#allocation2] sm:$0xff] }
  0xa9   :  { %v117_v42 = vmul.f32 %v116_v41, %v100_v40 }
  0xab   :  { %118 = vst.msk [vmem:[%s257_s3] sm:$0xff] %vm59_vm1, %v117_v42 }
  0xac   :  { %123 = vsyncpa [#allocation5], 1 }
  0xad   :  { %124 = vsyncpa [#allocation7], 1 }

</bundles_post_ra>
